<compile_context>
chip_gen: v6e
topology: v6e:2x2x1
jax: 0.10.0
libtpu: 0.0.40
codegen_flags: <defaults>
</compile_context>

<pallas_src>
import functools
import math

import jax
import jax.numpy as jnp
from jax.experimental import pallas as pl
from jax.experimental.pallas import tpu as pltpu


_PARAM_KEYS = ("nr", "kab", "kcar", "kant", "kw", "km")


# ---------------------------------------------------------------------------
# Kernels
# ---------------------------------------------------------------------------
def _penalty(param_refs):
    # sum(relu(-p)) == -sum(min(p, 0)); accumulate the (negative) partial sums
    # and negate once at the end.  Six tiny XLU reductions — XLU has slack,
    # the kernel is launch/DMA bound.
    neg = jnp.float32(0.0)
    for p in param_refs:
        neg = neg + jnp.sum(jnp.minimum(p[...], jnp.float32(0.0)))
    return -neg


def _kernel_no_tran(nr, kab, kcar, kant, kw, km, pred, targ, o_ref, *, inv_n):
    pen = _penalty((nr, kab, kcar, kant, kw, km))
    d = pred[...] - targ[...]
    o_ref[0, 0] = pen + jnp.sum(d * d) * jnp.float32(inv_n)


def _kernel_with_tran(nr, kab, kcar, kant, kw, km, pred, targ, pred_t, targ_t,
                      o_ref, *, inv_n, inv_n_t):
    pen = _penalty((nr, kab, kcar, kant, kw, km))
    # Two independent squared-error reductions: no full-size fused temporary,
    # and the two streams may have different shapes (as in torch's two
    # separate nn.MSELoss calls).
    d = pred[...] - targ[...]
    dt = pred_t[...] - targ_t[...]
    o_ref[0, 0] = (pen
                   + jnp.sum(d * d) * jnp.float32(inv_n)
                   + jnp.sum(dt * dt) * jnp.float32(inv_n_t))


# ---------------------------------------------------------------------------
# Wrapper
# ---------------------------------------------------------------------------
def _vmem_limit_bytes(total_input_bytes):
    """Scoped-VMEM request sized to the grid-less full-array inputs."""
    try:
        cap = int(pltpu.get_tpu_info().vmem_capacity_bytes)
    except Exception:
        cap = 64 << 20  # conservative (v7x physical)
    want = 2 * int(total_input_bytes) + (2 << 20)      # inputs + headroom
    return int(min(int(0.9 * cap), max(want, 32 << 20)))


def _as_f32_2d(x):
    """float32; lift 1-D vectors to (1, L) (a layout-preserving reshape)."""
    x = jnp.asarray(x, jnp.float32)
    return x.reshape(1, -1) if x.ndim < 2 else x


def lossfit(params, pred_ref, target_ref, pred_tran=None, target_tran=None):
    """params: dict with keys 'nr','kab','kcar','kant','kw','km' (1-D [L])."""
    p_args = [_as_f32_2d(params[k]) for k in _PARAM_KEYS]

    pred_ref = _as_f32_2d(pred_ref)
    target_ref = _as_f32_2d(target_ref)
    n_ref = math.prod(pred_ref.shape)

    inputs = p_args + [pred_ref, target_ref]

    if pred_tran is None or target_tran is None:
        kernel = functools.partial(_kernel_no_tran, inv_n=1.0 / float(n_ref))
    else:
        pred_tran = _as_f32_2d(pred_tran)
        target_tran = _as_f32_2d(target_tran)
        n_tr = math.prod(pred_tran.shape)
        inputs += [pred_tran, target_tran]
        kernel = functools.partial(_kernel_with_tran,
                                   inv_n=1.0 / float(n_ref),
                                   inv_n_t=1.0 / float(n_tr))

    total_bytes = sum(int(x.size) * x.dtype.itemsize for x in inputs)

    call = pl.pallas_call(
        kernel,
        out_shape=jax.ShapeDtypeStruct((1, 1), jnp.float32),
        in_specs=[pl.BlockSpec(memory_space=pltpu.VMEM)] * len(inputs),
        out_specs=pl.BlockSpec(memory_space=pltpu.SMEM),
        compiler_params=pltpu.CompilerParams(
            vmem_limit_bytes=_vmem_limit_bytes(total_bytes)),
    )
    return call(*inputs)[0, 0]


# ---------------------------------------------------------------------------
# Reference + self-test
# ---------------------------------------------------------------------------
def _reference(params, pred_ref, target_ref, pred_tran, target_tran):
    loss = jnp.float32(0.0)
    for k in _PARAM_KEYS:
        loss = loss + jnp.sum(jnp.maximum(-params[k], 0.0))
    loss = loss + jnp.mean((pred_ref - target_ref) ** 2)
    if pred_tran is not None and target_tran is not None:
        loss = loss + jnp.mean((pred_tran - target_tran) ** 2)
    return loss


if __name__ == "__main__":
    # Small synthetic shapes (the real model uses L = 2101 wavelengths).
    # L = 300 is deliberately NOT a multiple of 128 (no padding anywhere now);
    # the transmittance pair uses a DIFFERENT shape to exercise the decoupled
    # reductions.
    B, L = 8, 300
    Bt, Lt = 5, 257
    key = jax.random.PRNGKey(0)
    keys = jax.random.split(key, 10)

    # Deterministic synthetic "fitparams" vectors; normals so some entries are
    # negative and the clamp penalty is exercised.
    params = {
        "nr":   jax.random.normal(keys[0], (L,), jnp.float32) * 0.1 + 1.4,
        "kab":  jax.random.normal(keys[1], (L,), jnp.float32) * 0.05,
        "kcar": jax.random.normal(keys[2], (L,), jnp.float32) * 0.05,
        "kant": jax.random.normal(keys[3], (L,), jnp.float32) * 0.05,
        "kw":   jax.random.normal(keys[4], (L,), jnp.float32) * 0.05,
        "km":   jax.random.normal(keys[5], (L,), jnp.float32) * 0.05,
    }
    pred_ref = jax.random.uniform(keys[6], (B, L), jnp.float32)
    target_ref = jax.random.uniform(keys[7], (B, L), jnp.float32)
    pred_tran = jax.random.uniform(keys[8], (Bt, Lt), jnp.float32)
    target_tran = jax.random.uniform(keys[9], (Bt, Lt), jnp.float32)

    # With transmittance term (different shape from reflectance)
    loss = lossfit(params, pred_ref, target_ref, pred_tran, target_tran)
    loss = jax.block_until_ready(loss)
    ref = _reference(params, pred_ref, target_ref, pred_tran, target_tran)
    assert jnp.allclose(loss, ref, rtol=1e-5, atol=1e-5), (loss, ref)

    # Without transmittance term (separate kernel variant, no dummy arrays)
    loss2 = lossfit(params, pred_ref, target_ref)
    loss2 = jax.block_until_ready(loss2)
    ref2 = _reference(params, pred_ref, target_ref, None, None)
    assert jnp.allclose(loss2, ref2, rtol=1e-5, atol=1e-5), (loss2, ref2)

    print("KERNEL_OK")
</pallas_src>

<mosaic_0001>
module attributes {stable_mosaic.version = 11 : i64} {
  func.func @_kernel_with_tran(%arg0: memref<1x300xf32, #tpu.memory_space<vmem>>, %arg1: memref<1x300xf32, #tpu.memory_space<vmem>>, %arg2: memref<1x300xf32, #tpu.memory_space<vmem>>, %arg3: memref<1x300xf32, #tpu.memory_space<vmem>>, %arg4: memref<1x300xf32, #tpu.memory_space<vmem>>, %arg5: memref<1x300xf32, #tpu.memory_space<vmem>>, %arg6: memref<8x300xf32, #tpu.memory_space<vmem>>, %arg7: memref<8x300xf32, #tpu.memory_space<vmem>>, %arg8: memref<5x257xf32, #tpu.memory_space<vmem>>, %arg9: memref<5x257xf32, #tpu.memory_space<vmem>>, %arg10: memref<1x1xf32, #tpu.memory_space<smem>>) attributes {dimension_semantics = [], scalar_prefetch = 0 : i64, scratch_operands = 0 : i64, tpu.core_type = #tpu.core_type<tc>} {
    %c0 = arith.constant 0 : index
    %c0_0 = arith.constant 0 : index
    %0 = vector.load %arg0[%c0, %c0_0] : memref<1x300xf32, #tpu.memory_space<vmem>>, vector<1x300xf32>
    %cst = arith.constant 0.000000e+00 : f32
    %1 = vector.broadcast %cst : f32 to vector<1x300xf32>
    %2 = arith.minimumf %0, %1 : vector<1x300xf32>
    %3 = vector.shape_cast %2 : vector<1x300xf32> to vector<1x1x300xf32>
    %cst_1 = arith.constant dense<0.000000e+00> : vector<1xf32>
    %4 = vector.multi_reduction <add>, %3, %cst_1 [1, 2] : vector<1x1x300xf32> to vector<1xf32>
    %5 = vector.shape_cast %4 : vector<1xf32> to vector<1x1x1xf32>
    %6 = vector.extract %5[0, 0, 0] : f32 from vector<1x1x1xf32>
    %cst_2 = arith.constant 0.000000e+00 : f32
    %7 = arith.addf %cst_2, %6 : f32
    %c0_3 = arith.constant 0 : index
    %c0_4 = arith.constant 0 : index
    %8 = vector.load %arg1[%c0_3, %c0_4] : memref<1x300xf32, #tpu.memory_space<vmem>>, vector<1x300xf32>
    %cst_5 = arith.constant 0.000000e+00 : f32
    %9 = vector.broadcast %cst_5 : f32 to vector<1x300xf32>
    %10 = arith.minimumf %8, %9 : vector<1x300xf32>
    %11 = vector.shape_cast %10 : vector<1x300xf32> to vector<1x1x300xf32>
    %cst_6 = arith.constant dense<0.000000e+00> : vector<1xf32>
    %12 = vector.multi_reduction <add>, %11, %cst_6 [1, 2] : vector<1x1x300xf32> to vector<1xf32>
    %13 = vector.shape_cast %12 : vector<1xf32> to vector<1x1x1xf32>
    %14 = vector.extract %13[0, 0, 0] : f32 from vector<1x1x1xf32>
    %15 = arith.addf %7, %14 : f32
    %c0_7 = arith.constant 0 : index
    %c0_8 = arith.constant 0 : index
    %16 = vector.load %arg2[%c0_7, %c0_8] : memref<1x300xf32, #tpu.memory_space<vmem>>, vector<1x300xf32>
    %cst_9 = arith.constant 0.000000e+00 : f32
    %17 = vector.broadcast %cst_9 : f32 to vector<1x300xf32>
    %18 = arith.minimumf %16, %17 : vector<1x300xf32>
    %19 = vector.shape_cast %18 : vector<1x300xf32> to vector<1x1x300xf32>
    %cst_10 = arith.constant dense<0.000000e+00> : vector<1xf32>
    %20 = vector.multi_reduction <add>, %19, %cst_10 [1, 2] : vector<1x1x300xf32> to vector<1xf32>
    %21 = vector.shape_cast %20 : vector<1xf32> to vector<1x1x1xf32>
    %22 = vector.extract %21[0, 0, 0] : f32 from vector<1x1x1xf32>
    %23 = arith.addf %15, %22 : f32
    %c0_11 = arith.constant 0 : index
    %c0_12 = arith.constant 0 : index
    %24 = vector.load %arg3[%c0_11, %c0_12] : memref<1x300xf32, #tpu.memory_space<vmem>>, vector<1x300xf32>
    %cst_13 = arith.constant 0.000000e+00 : f32
    %25 = vector.broadcast %cst_13 : f32 to vector<1x300xf32>
    %26 = arith.minimumf %24, %25 : vector<1x300xf32>
    %27 = vector.shape_cast %26 : vector<1x300xf32> to vector<1x1x300xf32>
    %cst_14 = arith.constant dense<0.000000e+00> : vector<1xf32>
    %28 = vector.multi_reduction <add>, %27, %cst_14 [1, 2] : vector<1x1x300xf32> to vector<1xf32>
    %29 = vector.shape_cast %28 : vector<1xf32> to vector<1x1x1xf32>
    %30 = vector.extract %29[0, 0, 0] : f32 from vector<1x1x1xf32>
    %31 = arith.addf %23, %30 : f32
    %c0_15 = arith.constant 0 : index
    %c0_16 = arith.constant 0 : index
    %32 = vector.load %arg4[%c0_15, %c0_16] : memref<1x300xf32, #tpu.memory_space<vmem>>, vector<1x300xf32>
    %cst_17 = arith.constant 0.000000e+00 : f32
    %33 = vector.broadcast %cst_17 : f32 to vector<1x300xf32>
    %34 = arith.minimumf %32, %33 : vector<1x300xf32>
    %35 = vector.shape_cast %34 : vector<1x300xf32> to vector<1x1x300xf32>
    %cst_18 = arith.constant dense<0.000000e+00> : vector<1xf32>
    %36 = vector.multi_reduction <add>, %35, %cst_18 [1, 2] : vector<1x1x300xf32> to vector<1xf32>
    %37 = vector.shape_cast %36 : vector<1xf32> to vector<1x1x1xf32>
    %38 = vector.extract %37[0, 0, 0] : f32 from vector<1x1x1xf32>
    %39 = arith.addf %31, %38 : f32
    %c0_19 = arith.constant 0 : index
    %c0_20 = arith.constant 0 : index
    %40 = vector.load %arg5[%c0_19, %c0_20] : memref<1x300xf32, #tpu.memory_space<vmem>>, vector<1x300xf32>
    %cst_21 = arith.constant 0.000000e+00 : f32
    %41 = vector.broadcast %cst_21 : f32 to vector<1x300xf32>
    %42 = arith.minimumf %40, %41 : vector<1x300xf32>
    %43 = vector.shape_cast %42 : vector<1x300xf32> to vector<1x1x300xf32>
    %cst_22 = arith.constant dense<0.000000e+00> : vector<1xf32>
    %44 = vector.multi_reduction <add>, %43, %cst_22 [1, 2] : vector<1x1x300xf32> to vector<1xf32>
    %45 = vector.shape_cast %44 : vector<1xf32> to vector<1x1x1xf32>
    %46 = vector.extract %45[0, 0, 0] : f32 from vector<1x1x1xf32>
    %47 = arith.addf %39, %46 : f32
    %cst_23 = arith.constant 0.000000e+00 : f32
    %48 = arith.subf %cst_23, %47 : f32
    %c0_24 = arith.constant 0 : index
    %c0_25 = arith.constant 0 : index
    %49 = vector.load %arg6[%c0_24, %c0_25] : memref<8x300xf32, #tpu.memory_space<vmem>>, vector<8x300xf32>
    %c0_26 = arith.constant 0 : index
    %c0_27 = arith.constant 0 : index
    %50 = vector.load %arg7[%c0_26, %c0_27] : memref<8x300xf32, #tpu.memory_space<vmem>>, vector<8x300xf32>
    %51 = arith.subf %49, %50 : vector<8x300xf32>
    %c0_28 = arith.constant 0 : index
    %c0_29 = arith.constant 0 : index
    %52 = vector.load %arg8[%c0_28, %c0_29] : memref<5x257xf32, #tpu.memory_space<vmem>>, vector<5x257xf32>
    %c0_30 = arith.constant 0 : index
    %c0_31 = arith.constant 0 : index
    %53 = vector.load %arg9[%c0_30, %c0_31] : memref<5x257xf32, #tpu.memory_space<vmem>>, vector<5x257xf32>
    %54 = arith.subf %52, %53 : vector<5x257xf32>
    %55 = arith.mulf %51, %51 : vector<8x300xf32>
    %56 = vector.shape_cast %55 : vector<8x300xf32> to vector<1x8x300xf32>
    %cst_32 = arith.constant dense<0.000000e+00> : vector<1xf32>
    %57 = vector.multi_reduction <add>, %56, %cst_32 [1, 2] : vector<1x8x300xf32> to vector<1xf32>
    %58 = vector.shape_cast %57 : vector<1xf32> to vector<1x1x1xf32>
    %59 = vector.extract %58[0, 0, 0] : f32 from vector<1x1x1xf32>
    %cst_33 = arith.constant 4.16666677E-4 : f32
    %60 = arith.mulf %59, %cst_33 : f32
    %61 = arith.addf %48, %60 : f32
    %62 = arith.mulf %54, %54 : vector<5x257xf32>
    %63 = vector.shape_cast %62 : vector<5x257xf32> to vector<1x5x257xf32>
    %cst_34 = arith.constant dense<0.000000e+00> : vector<1xf32>
    %64 = vector.multi_reduction <add>, %63, %cst_34 [1, 2] : vector<1x5x257xf32> to vector<1xf32>
    %65 = vector.shape_cast %64 : vector<1xf32> to vector<1x1x1xf32>
    %66 = vector.extract %65[0, 0, 0] : f32 from vector<1x1x1xf32>
    %cst_35 = arith.constant 7.78210117E-4 : f32
    %67 = arith.mulf %66, %cst_35 : f32
    %68 = arith.addf %61, %67 : f32
    %c0_36 = arith.constant 0 : index
    %c0_37 = arith.constant 0 : index
    %69 = memref.load %arg10[%c0_36, %c0_37] : memref<1x1xf32, #tpu.memory_space<smem>>
    memref.store %68, %arg10[%c0_36, %c0_37] : memref<1x1xf32, #tpu.memory_space<smem>>
    return
  }
}

</mosaic_0001>

<bundles_post_ra>
// kernel: tpu_custom_call.1
= control target key start
LH: loop header
LB: loop body
LE: loop exit
PB: predicated region body
PF: predicated region fallthrough
CT: control target
= control target key end

     0   :  { %15 = vsyncpa [#allocation3], 0  ;;  %s717_s0 = inlined_call_operand.hbm [shape: f32[1,300], index: 0, kind: input, shape index: {}]   ;;  %s718_s1 = inlined_call_operand.hbm [shape: f32[1,300], index: 1, kind: input, shape index: {}]   ;;  %s719_s2 = inlined_call_operand.vmem [shape: f32[1,300], index: 2, kind: input, shape index: {}]   ;;  %s720_s3 = inlined_call_operand.hbm [shape: f32[1,300], index: 3, kind: input, shape index: {}]   ;;  %s721_s4 = inlined_call_operand.vmem [shape: f32[1,300], index: 4, kind: input, shape index: {}]   ;;  %s722_s5 = inlined_call_operand.vmem [shape: f32[1,300], index: 5, kind: input, shape index: {}]   ;;  %s723_s6 = inlined_call_operand.hbm [shape: f32[8,300], index: 6, kind: input, shape index: {}]   ;;  %s724_s7 = inlined_call_operand.hbm [shape: f32[8,300], index: 7, kind: input, shape index: {}]   ;;  %s725_s8 = inlined_call_operand.hbm [shape: f32[5,257], index: 8, kind: input, shape index: {}]   ;;  %s726_s9 = inlined_call_operand.hbm [shape: f32[5,257], index: 9, kind: input, shape index: {}]   ;;  %s727_s10 = inlined_call_operand.hbm [shape: f32[1,1], index: 10, kind: output, shape index: {}]  }
   0x1   :  { %16 = vsyncpa [#allocation6], 0 }
   0x2   :  { %17 = vsyncpa [#allocation9], 0 }
   0x3   :  { %18 = vsyncpa [#allocation12], 0 }
   0x4   :  { %19 = vsyncpa [#allocation4], 0  ;;  %s576_s13 = smov [#allocation5]   ;;  %s577_s15 = smov [#allocation8]  }
   0x5   :  { %s36_s14 = sshll.u32 %s576_s13, 4  ;;  %s62_s16 = sshll.u32 %s577_s15, 4  ;;  %s37_s14 = int_to_ptr.vmem [resolvable:$true] %s36_s14  ;;  %s63_s16 = int_to_ptr.vmem [resolvable:$true] %s62_s16 }
   0x6   :  { %s426_s17 = scalar_lea.vmem %s37_s14, 48  ;;  %s430_s18 = scalar_lea.vmem %s37_s14, 64 }
   0x7   :  { %p427_p0 = scmp.ne.s32.totalorder %s37_s14, %s426_s17  ;;  %p431_p1 = scmp.lt.s32.totalorder %s37_s14, %s37_s14 }
   0x8   :  { %p432_p2 = scmp.lt.s32.totalorder %s430_s18, %s426_s17 }
   0xa   :  { %p433_p3 = por %p432_p2, %p431_p1 }
   0xc   :  { %p434_p4 = pnand %p433_p3, %p427_p0 }
   0xe   :  { %437 = shalt.err (!%p434_p4)
}
   0xf   :  { %39 = dma.hbm_to_vmem [thread:$0]  %s718_s1, 48, %s37_s14, [#allocation6]  }
  0x10   :  { %s446_s21 = scalar_lea.vmem %s63_s16, 384  ;;  %p451_p6 = scmp.lt.s32.totalorder %s63_s16, %s63_s16 }
  0x11   :  { %p447_p5 = scmp.ne.s32.totalorder %s63_s16, %s446_s21  ;;  %p452_p7 = scmp.lt.s32.totalorder %s446_s21, %s446_s21 }
  0x13   :  { %p453_p8 = por %p452_p7, %p451_p6 }
  0x15   :  { %p454_p9 = pnand %p453_p8, %p447_p5 }
  0x17   :  { %457 = shalt.err (!%p454_p9)
}
  0x18   :  { %65 = dma.hbm_to_vmem [thread:$0]  %s723_s6, 384, %s63_s16, [#allocation9]  }
  0x19   :  { %s578_s24 = smov [#allocation11]   ;;  %s579_s26 = smov [#allocation2]  }
  0x1a   :  { %s82_s25 = sshll.u32 %s578_s24, 4  ;;  %s26_s27 = sshll.u32 %s579_s26, 4  ;;  %s83_s25 = int_to_ptr.vmem [resolvable:$true] %s82_s25  ;;  %s27_s27 = int_to_ptr.vmem [resolvable:$true] %s26_s27 }
  0x1b   :  { %s466_s28 = scalar_lea.vmem %s83_s25, 384  ;;  %p471_p11 = scmp.lt.s32.totalorder %s83_s25, %s83_s25 }
  0x1c   :  { %p467_p10 = scmp.ne.s32.totalorder %s83_s25, %s466_s28  ;;  %p472_p12 = scmp.lt.s32.totalorder %s466_s28, %s466_s28 }
  0x1e   :  { %p473_p13 = por %p472_p12, %p471_p11 }
  0x20   :  { %p474_p0 = pnand %p473_p13, %p467_p10 }
  0x22   :  { %477 = shalt.err (!%p474_p0)
}
  0x23   :  { %85 = dma.hbm_to_vmem [thread:$0]  %s725_s8, 384, %s83_s25, [#allocation12]  }
  0x24   :  { %s486_s30 = scalar_lea.vmem %s27_s27, 48  ;;  %s490_s6 = scalar_lea.vmem %s27_s27, 64 }
  0x25   :  { %p487_p1 = scmp.ne.s32.totalorder %s27_s27, %s486_s30  ;;  %p491_p2 = scmp.lt.s32.totalorder %s27_s27, %s27_s27 }
  0x26   :  { %p492_p3 = scmp.lt.s32.totalorder %s490_s6, %s486_s30 }
  0x28   :  { %p493_p4 = por %p492_p3, %p491_p2 }
  0x2a   :  { %p494_p5 = pnand %p493_p4, %p487_p1 }
  0x2c   :  { %497 = shalt.err (!%p494_p5)
}
  0x2d   :  { %29 = dma.hbm_to_vmem [thread:$0]  %s717_s0, 48, %s27_s27, [#allocation3]  }
  0x2e   :  { %s580_s13 = smov [#allocation7]   ;;  %s581_s15 = smov [#allocation10]  }
  0x2f   :  { %s48_s14 = sshll.u32 %s580_s13, 4  ;;  %s72_s16 = sshll.u32 %s581_s15, 4  ;;  %s49_s14 = int_to_ptr.vmem [resolvable:$true] %s48_s14  ;;  %s73_s16 = int_to_ptr.vmem [resolvable:$true] %s72_s16 }
  0x30   :  { %s506_s17 = scalar_lea.vmem %s49_s14, 48  ;;  %s510_s8 = scalar_lea.vmem %s49_s14, 64 }
  0x31   :  { %p507_p6 = scmp.ne.s32.totalorder %s49_s14, %s506_s17  ;;  %p511_p7 = scmp.lt.s32.totalorder %s49_s14, %s49_s14 }
  0x32   :  { %p512_p8 = scmp.lt.s32.totalorder %s510_s8, %s506_s17 }
  0x34   :  { %p513_p9 = por %p512_p8, %p511_p7 }
  0x36   :  { %p514_p10 = pnand %p513_p9, %p507_p6 }
  0x38   :  { %517 = shalt.err (!%p514_p10)
}
  0x39   :  { %51 = dma.hbm_to_vmem [thread:$0]  %s720_s3, 48, %s49_s14, [#allocation6]  }
  0x3a   :  { %s526_s20 = scalar_lea.vmem %s73_s16, 384  ;;  %p531_p12 = scmp.lt.s32.totalorder %s73_s16, %s73_s16 }
  0x3b   :  { %p527_p11 = scmp.ne.s32.totalorder %s73_s16, %s526_s20  ;;  %p532_p13 = scmp.lt.s32.totalorder %s526_s20, %s526_s20 }
  0x3d   :  { %p533_p0 = por %p532_p13, %p531_p12 }
  0x3f   :  { %p534_p1 = pnand %p533_p0, %p527_p11 }
  0x41   :  { %537 = shalt.err (!%p534_p1)
}
  0x42   :  { %75 = dma.hbm_to_vmem [thread:$0]  %s724_s7, 384, %s73_s16, [#allocation9]  }
  0x43   :  { %s582_s22 = smov [#allocation13]  }
  0x44   :  { %s92_s23 = sshll.u32 %s582_s22, 4  ;;  %s93_s23 = int_to_ptr.vmem [resolvable:$true] %s92_s23 }
  0x45   :  { %s546_s24 = scalar_lea.vmem %s93_s23, 384  ;;  %p551_p3 = scmp.lt.s32.totalorder %s93_s23, %s93_s23 }
  0x46   :  { %p547_p2 = scmp.ne.s32.totalorder %s93_s23, %s546_s24  ;;  %p552_p4 = scmp.lt.s32.totalorder %s546_s24, %s546_s24 }
  0x48   :  { %p553_p5 = por %p552_p4, %p551_p3 }
  0x4a   :  { %p554_p6 = pnand %p553_p5, %p547_p2 }
  0x4c   :  { %557 = shalt.err (!%p554_p6)
}
  0x4d   :  { %95 = dma.hbm_to_vmem [thread:$0]  %s726_s9, 384, %s93_s23, [#allocation12]  }
  0x4e   :  { %566 = dma.done.wait [#allocation3], 48  }
  0x4f   :  { %567 = vsyncadd [#allocation3], 4294967248 }
  0x50   :  { %568 = dma.done.wait [#allocation6], 96  }
  0x51   :  { %569 = vsyncadd [#allocation6], 4294967200 }
  0x52   :  { %570 = dma.done.wait [#allocation9], 768  }
  0x53   :  { %571 = vsyncadd [#allocation9], 4294966528 }
  0x54   :  { %572 = dma.done.wait [#allocation12], 768  }
  0x55   :  { %573 = vsyncadd [#allocation12], 4294966528  ;;  %v120_v0 = vlaneseq  ;;  %v185_v5 = vld [vmem:[%s719_s2] sm:$0x7]  ;;  %v218_v7 = vld [vmem:[#allocation7] sm:$0x7] }
  0x56   :  { %v117_v6 = vld [vmem:[#allocation2] sm:$0x7]  ;;  %v186_v8 = vmin.f32 %v185_v5, 0.0  ;;  %v219_v10 = vmin.f32 %v218_v7, 0.0  ;;  %v152_v11 = vld [vmem:[#allocation5] sm:$0x7] }
  0x57   :  { %v121_v1 = vshrl.u32 %v120_v0, 7  ;;  %v118_v9 = vmin.f32 %v117_v6, 0.0  ;;  %vm135_vm0 = vcmask 1040384   ;;  %vm139_vm1 = vcmask 352256   ;;  %v284_v29 = vld [vmem:[%s722_s5] sm:$0x7] }
  0x58   :  { %v153_v12 = vmin.f32 %v152_v11, 0.0  ;;  %v251_v30 = vld [vmem:[%s721_s4] sm:$0x7]  ;;  %vm357_vm2 = vcmask 1044480   ;;  %v330_v36 = vld [vmem:[#allocation13] sm:$0x1f] }
  0x59   :  { %v660_v2 = vsub.s32 0, %v121_v1  ;;  %v662_v3 = vsub.s32 1, %v121_v1  ;;  %v664_v4 = vsub.s32 2, %v121_v1  ;;  %v327_v35 = vld [vmem:[#allocation11] sm:$0x1f]  ;;  %vm361_vm3 = vcmask 4096  }
  0x5a   :  { %v285_v44 = vmin.f32 %v284_v29, 0.0  ;;  %v252_v47 = vmin.f32 %v251_v30, 0.0  ;;  %v328_v48 = vld [vmem:[#allocation11 + $0x8] sm:$0x1f]  ;;  %v331_v49 = vld [vmem:[#allocation13 + $0x8] sm:$0x1f]  ;;  %v333_v50 = vsub.f32 %v327_v35, %v330_v36 }
  0x5b   :  { %v191_v13 = vrot.slane %v186_v8, %v660_v2  ;;  %v195_v14 = vrot.slane %v186_v8, %v662_v3  ;;  %v199_v15 = vrot.slane %v186_v8, %v664_v4  ;;  %v123_v16 = vrot.slane %v118_v9, %v660_v2  ;;  %v329_v59 = vld [vmem:[#allocation11 + $0x10] sm:$0x1f]  ;;  %v332_v60 = vld [vmem:[#allocation13 + $0x10] sm:$0x1f]  ;;  %v319_v5 = vld [vmem:[#allocation8 + $0x8] sm:$0xff]  ;;  %s583_s21 = smov [#allocation14]  }
  0x5c   :  { %v127_v17 = vrot.slane %v118_v9, %v662_v3  ;;  %v131_v18 = vrot.slane %v118_v9, %v664_v4  ;;  %v224_v19 = vrot.slane %v219_v10, %v660_v2  ;;  %v228_v20 = vrot.slane %v219_v10, %v662_v3  ;;  %v318_v61 = vld [vmem:[#allocation8] sm:$0xff]  ;;  %v321_v6 = vld [vmem:[#allocation10] sm:$0xff]  ;;  %v320_v9 = vld [vmem:[#allocation8 + $0x10] sm:$0xff] }
  0x5d   :  { %v203_v21 = vsel %vm135_vm0, %v191_v13, 0.0  ;;  %v204_v22 = vsel %vm135_vm0, %v195_v14, 0.0  ;;  %v206_v23 = vsel %vm139_vm1, %v199_v15, 0.0  ;;  %v136_v24 = vsel %vm135_vm0, %v123_v16, 0.0  ;;  %v322_v7 = vld [vmem:[#allocation10 + $0x8] sm:$0xff] }
  0x5e   :  { %v205_v25 = vadd.f32 %v204_v22, %v203_v21  ;;  %v137_v26 = vsel %vm135_vm0, %v127_v17, 0.0  ;;  %v140_v27 = vsel %vm139_vm1, %v131_v18, 0.0  ;;  %v232_v28 = vrot.slane %v219_v10, %v664_v4  ;;  %v323_v10 = vld [vmem:[#allocation10 + $0x10] sm:$0xff] }
  0x5f   :  { %v138_v31 = vadd.f32 %v137_v26, %v136_v24  ;;  %v236_v32 = vsel %vm135_vm0, %v224_v19, 0.0  ;;  %v237_v33 = vsel %vm135_vm0, %v228_v20, 0.0  ;;  %v158_v34 = vrot.slane %v153_v12, %v660_v2 }
  0x60   :  { %v207_v37 = vadd.f32 %v206_v23, %v205_v25  ;;  %v238_v38 = vadd.f32 %v237_v33, %v236_v32  ;;  %v239_v39 = vsel %vm139_vm1, %v232_v28, 0.0  ;;  %v162_v40 = vrot.slane %v153_v12, %v662_v3 }
  0x61   :  { %v141_v41 = vadd.f32 %v140_v27, %v138_v31  ;;  %v166_v42 = vrot.slane %v153_v12, %v664_v4  ;;  %v170_v43 = vsel %vm135_vm0, %v158_v34, 0.0  ;;  %v290_v53 = vrot.slane %v285_v44, %v660_v2 }
  0x62   :  { %208 = vadd.xlane.f32.xlu1 %v207_v37  ;;  %v240_v45 = vadd.f32 %v239_v39, %v238_v38  ;;  %v171_v46 = vsel %vm135_vm0, %v162_v40, 0.0  ;;  %v294_v54 = vrot.slane %v285_v44, %v662_v3  ;;  %v298_v55 = vrot.slane %v285_v44, %v664_v4 }
  0x63   :  { %142 = vadd.xlane.f32.xlu0 %v141_v41  ;;  %v172_v51 = vadd.f32 %v171_v46, %v170_v43  ;;  %v173_v52 = vsel %vm139_vm1, %v166_v42, 0.0  ;;  %v257_v56 = vrot.slane %v252_v47, %v660_v2  ;;  %v261_v57 = vrot.slane %v252_v47, %v662_v3 }
  0x64   :  { %v265_v58 = vrot.slane %v252_v47, %v664_v4  ;;  %v302_v63 = vsel %vm135_vm0, %v290_v53, 0.0  ;;  %v303_v0 = vsel %vm135_vm0, %v294_v54, 0.0  ;;  %v334_v1 = vsub.f32 %v328_v48, %v331_v49 }
  0x65   :  { %v174_v62 = vadd.f32 %v173_v52, %v172_v51  ;;  %v304_v8 = vadd.f32 %v303_v0, %v302_v63  ;;  %v305_v2 = vsel %vm139_vm1, %v298_v55, 0.0  ;;  %v269_v3 = vsel %vm135_vm0, %v257_v56, 0.0 }
  0x66   :  { %241 = vadd.xlane.f32.xlu1 %v240_v45  ;;  %v270_v4 = vsel %vm135_vm0, %v261_v57, 0.0  ;;  %v272_v12 = vsel %vm139_vm1, %v265_v58, 0.0  ;;  %v335_v13 = vsub.f32 %v329_v59, %v332_v60  ;;  %v354_v14 = vmul.f32 %v333_v50, %v333_v50 }
  0x67   :  { %175 = vadd.xlane.f32.xlu0 %v174_v62  ;;  %v271_v11 = vadd.f32 %v270_v4, %v269_v3  ;;  %v306_v15 = vadd.f32 %v305_v2, %v304_v8  ;;  %v355_v16 = vmul.f32 %v334_v1, %v334_v1  ;;  %v324_v17 = vsub.f32 %v318_v61, %v321_v6 }
  0x68   :  { %v325_v18 = vsub.f32 %v319_v5, %v322_v7  ;;  %v356_v20 = vmul.f32 %v335_v13, %v335_v13  ;;  %v358_v21 = vsel %vm357_vm2, %v354_v14, 0.0  ;;  %v326_v22 = vsub.f32 %v320_v9, %v323_v10 }
  0x69   :  { %v273_v19 = vadd.f32 %v272_v12, %v271_v11  ;;  %v359_v23 = vsel %vm357_vm2, %v355_v16, 0.0  ;;  %v336_v24 = vmul.f32 %v324_v17, %v324_v17  ;;  %vm340_vm4 = vcmask 359424  }
  0x6a   :  { %307 = vadd.xlane.f32.xlu1 %v306_v15  ;;  %v337_v25 = vmul.f32 %v325_v18, %v325_v18  ;;  %v360_v26 = vadd.f32 %v359_v23, %v358_v21  ;;  %v362_v27 = vsel %vm361_vm3, %v356_v20, 0.0  ;;  %v338_v28 = vmul.f32 %v326_v22, %v326_v22 }
  0x6b   :  { %274 = vadd.xlane.f32.xlu0 %v273_v19 }
  0x6c   :  { %v339_v29 = vadd.f32 %v337_v25, %v336_v24  ;;  %v363_v30 = vadd.f32 %v362_v27, %v360_v26  ;;  %v341_v31 = vsel %vm340_vm4, %v338_v28, 0.0 }
  0x6e   :  { %v342_v32 = vadd.f32 %v341_v31, %v339_v29  ;;  %364 = vadd.xlane.f32.xlu1 %v363_v30 }
  0x70   :  { %343 = vadd.xlane.f32.xlu0 %v342_v32 }
  0xeb   :  { %v209_v33 = vpop.xlane.xlu1 %208 }
  0xec   :  { %v210_v34 = vrot.slane %v209_v33, 4  ;;  %v143_v35 = vpop.xlane.xlu0 %142 }
  0xed   :  { %v144_v36 = vrot.slane %v143_v35, 4 }
  0xee   :  { %v211_v37 = vadd.f32 %v210_v34, %v209_v33 }
  0xef   :  { %v145_v38 = vadd.f32 %v144_v36, %v143_v35  ;;  %v242_v39 = vpop.xlane.xlu1 %241 }
  0xf0   :  { %v212_v40 = vrot.slane %v211_v37, 2  ;;  %v243_v41 = vrot.slane %v242_v39, 4  ;;  %v176_v42 = vpop.xlane.xlu0 %175 }
  0xf1   :  { %v146_v43 = vrot.slane %v145_v38, 2  ;;  %v177_v44 = vrot.slane %v176_v42, 4 }
  0xf2   :  { %v244_v45 = vadd.f32 %v243_v41, %v242_v39  ;;  %v213_v52 = vadd.f32 %v212_v40, %v211_v37 }
  0xf3   :  { %v178_v46 = vadd.f32 %v177_v44, %v176_v42  ;;  %v308_v47 = vpop.xlane.xlu1 %307  ;;  %v147_v48 = vadd.f32 %v146_v43, %v145_v38 }
  0xf4   :  { %v245_v49 = vrot.slane %v244_v45, 2  ;;  %v309_v50 = vrot.slane %v308_v47, 4  ;;  %v275_v51 = vpop.xlane.xlu0 %274  ;;  %v214_v63 = vrot.slane %v213_v52, 1 }
  0xf5   :  { %v179_v53 = vrot.slane %v178_v46, 2  ;;  %v276_v54 = vrot.slane %v275_v51, 4  ;;  %v148_v55 = vrot.slane %v147_v48, 1 }
  0xf6   :  { %v310_v56 = vadd.f32 %v309_v50, %v308_v47  ;;  %v246_v57 = vadd.f32 %v245_v49, %v244_v45  ;;  %v215_v12 = vadd.f32 %v214_v63, %v213_v52 }
  0xf7   :  { %v277_v58 = vadd.f32 %v276_v54, %v275_v51  ;;  %v149_v59 = vadd.f32 %v148_v55, %v147_v48  ;;  %v180_v60 = vadd.f32 %v179_v53, %v178_v46  ;;  %v365_v62 = vpop.xlane.xlu1 %364 }
  0xf8   :  { %v311_v61 = vrot.slane %v310_v56, 2  ;;  %v247_v0 = vrot.slane %v246_v57, 1  ;;  %v366_v5 = vrot.slane %v365_v62, 4 }
  0xf9   :  { %v278_v1 = vrot.slane %v277_v58, 2  ;;  %v344_v6 = vpop.xlane.xlu0 %343  ;;  %394 = vpush %v149_v59  ;;  %v181_v7 = vrot.slane %v180_v60, 1 }
  0xfa   :  { %v345_v8 = vrot.slane %v344_v6, 4  ;;  %v312_v2 = vadd.f32 %v311_v61, %v310_v56  ;;  %v367_v3 = vadd.f32 %v366_v5, %v365_v62  ;;  %v248_v9 = vadd.f32 %v247_v0, %v246_v57 }
  0xfb   :  { %v182_v4 = vadd.f32 %v181_v7, %v180_v60  ;;  %v279_v10 = vadd.f32 %v278_v1, %v277_v58 }
  0xfc   :  { %v346_v11 = vadd.f32 %v345_v8, %v344_v6  ;;  %v313_v13 = vrot.slane %v312_v2, 1  ;;  %v368_v14 = vrot.slane %v367_v3, 2 }
  0xfd   :  { %396 = vpush %v182_v4  ;;  %v280_v15 = vrot.slane %v279_v10, 1 }
  0xfe   :  { %v347_v16 = vrot.slane %v346_v11, 2  ;;  %398 = vpush %v215_v12  ;;  %v314_v17 = vadd.f32 %v313_v13, %v312_v2  ;;  %v369_v18 = vadd.f32 %v368_v14, %v367_v3 }
  0xff   :  { %400 = vpush %v248_v9  ;;  %v281_v19 = vadd.f32 %v280_v15, %v279_v10 }
 0x100   :  { %v348_v20 = vadd.f32 %v347_v16, %v346_v11  ;;  %v370_v21 = vrot.slane %v369_v18, 1 }
 0x101   :  { %402 = vpush %v281_v19 }
 0x102   :  { %404 = vpush %v314_v17  ;;  %v349_v22 = vrot.slane %v348_v20, 1  ;;  %v371_v23 = vadd.f32 %v370_v21, %v369_v18 }
 0x104   :  { %v350_v24 = vadd.f32 %v349_v22, %v348_v20 }
 0x106   :  { %406 = vpush %v350_v24 }
 0x107   :  { %408 = vpush %v371_v23 }
 0x12a   :  { %s395_s4 = spop %394 }
 0x12e   :  { %s397_s5 = spop %396 }
 0x12f   :  { %s184_s1 = sadd.f32 %s397_s5, %s395_s4  ;;  %s399_s29 = spop %398 }
 0x130   :  { %s401_s6 = spop %400 }
 0x131   :  { %s217_s30 = sadd.f32 %s399_s29, %s184_s1 }
 0x132   :  { %s403_s12 = spop %402 }
 0x133   :  { %s250_s11 = sadd.f32 %s401_s6, %s217_s30  ;;  %s405_s14 = spop %404 }
 0x135   :  { %s283_s13 = sadd.f32 %s403_s12, %s250_s11 }
 0x137   :  { %s316_s15 = sadd.f32 %s405_s14, %s283_s13  ;;  %s407_s16 = spop %406 }
 0x138   :  { %s409_s17 = spop %408  ;;  %s352_s18 = smul.f32 0.00041666668, %s407_s16 }
 0x139   :  { %s317_s8 = ssub.f32 0.0, %s316_s15  ;;  %s373_s20 = smul.f32 0.0007782101, %s409_s17 }
 0x13b   :  { %s353_s19 = sadd.f32 %s352_s18, %s317_s8 }
 0x13d   :  { %s374_s0 = sadd.f32 %s373_s20, %s353_s19 }
 0x13f   :  { %376 = sst [smem:[#allocation14]] %s374_s0 }
 0x140   :  { %384 = dma.smem_to_hbm %s583_s21, 16, %s727_s10, [#allocation4]  }
 0x141   :  { %574 = dma.done.wait [#allocation4], 16  }
 0x142   :  { %575 = vsyncadd [#allocation4], 4294967280 }
 0x143   :  { %388 = sfence }
 0x144   :  { %389 = vsyncpa [#allocation3], 1 }
 0x145   :  { %390 = vsyncpa [#allocation6], 1 }
 0x146   :  { %391 = vsyncpa [#allocation9], 1 }
 0x147   :  { %392 = vsyncpa [#allocation12], 1 }
 0x148   :  { %393 = vsyncpa [#allocation4], 1 }

</bundles_post_ra>
